<compile_context>
chip_gen: v7x
topology: tpu7x:2x2x1
jax: 0.10.0
libtpu: 0.0.40
codegen_flags: <defaults>
</compile_context>

<pallas_src>
import functools
import math

import numpy as np
import jax
import jax.numpy as jnp
from jax.experimental import pallas as pl
from jax.experimental.pallas import tpu as pltpu


# --------------------------------------------------------------------------- #
# Kernel
# --------------------------------------------------------------------------- #

def _cascading_kernel(x_ref, masks_ref, w3_ref, b3_ref, w1_ref, b1_ref, o_ref,
                      stack_ref, bank_ref,
                      *, c, r_pad, width, roll_matches_jnp, compute_dtype):
    """Whole _CascadingBlock for one image, everything resident in VMEM.

    x_ref:     (C, R)       activation, R = padded H*W on lanes (lane dense)
    masks_ref: (8, R)       boundary masks for the 8 non-center taps (cd dtype)
    w3_ref:    (6, C, 9C)   six 3x3 convs packed as (Cout, tap-major 9*Cin)
    b3_ref:    (6, C, 1)    3x3 conv biases (f32)
    w1_ref:    (3, C, 4C)   1x1 conv weights, zero-padded along K to 4C
    b1_ref:    (3, C, 1)    1x1 conv biases (f32)
    o_ref:     (C, R)       output
    stack_ref: (9C, R)      scratch: stacked tap operand (compute_dtype)
    bank_ref:  (4C, R)      scratch: feature bank [rb1, x, rb2, rb3] (cd)
    """
    f32 = jnp.float32
    cd = compute_dtype

    taps = [(dh, dw) for dh in (-1, 0, 1) for dw in (-1, 0, 1)]   # kh*3+kw order

    def shifted(v, off):
        # y[:, i] = v[:, i + off] (circular; wrapped lanes masked by caller)
        amt = ((-off) if roll_matches_jnp else off) % r_pad
        if amt == 0:
            return v
        return pltpu.roll(v, amt, 1)                              # XLU lane rotate

    def conv3x3(v_cd, widx):
        # Build the (9C, R) stacked tap operand; the boundary mask is fused
        # into the stack write (no standalone mask passes).  Then contract
        # against the packed (C, 9C) weight in ONE MXU matmul (K = 9C).
        for k, (dh, dw) in enumerate(taps):
            off = dh * width + dw
            tap = v_cd if off == 0 else shifted(v_cd, off)
            if not (dh == 0 and dw == 0):
                mrow = k if k < 4 else k - 1                      # center skipped
                tap = tap * masks_ref[mrow:mrow + 1, :]           # (C,R)*(1,R)
            stack_ref[k * c:(k + 1) * c, :] = tap
        acc = jnp.dot(w3_ref[widx], stack_ref[...],
                      preferred_element_type=f32)                 # (C, R) f32
        return acc + b3_ref[widx]

    def residual_block(v_f32, base):
        v_cd = v_f32.astype(cd)                                   # cast once
        mid = jnp.maximum(conv3x3(v_cd, base), 0.0)
        out = jnp.maximum(conv3x3(mid.astype(cd), base + 1) + v_f32, 0.0)
        return out                                                # f32

    def conv1x1(kmult, idx):
        # "Concat" = prefix slice of the feature bank; one dot with K=kmult*C.
        wk = w1_ref[idx][:, :kmult * c]                           # (C, kmult*C)
        acc = jnp.dot(wk, bank_ref[:kmult * c, :],
                      preferred_element_type=f32)
        return jnp.maximum(acc + b1_ref[idx], 0.0)                # f32

    x = x_ref[...].astype(f32)                                    # (C, R)
    # Feature-bank row layout (matches torch.cat order): [rb1 | x | rb2 | rb3]
    bank_ref[c:2 * c, :] = x.astype(cd)

    rb1 = residual_block(x, 0)
    bank_ref[0:c, :] = rb1.astype(cd)
    c1 = conv1x1(2, 0)                                            # cat1 = [rb1, x]

    rb2 = residual_block(c1, 2)
    bank_ref[2 * c:3 * c, :] = rb2.astype(cd)
    c2 = conv1x1(3, 1)                                            # cat2 = [rb1, x, rb2]

    rb3 = residual_block(c2, 4)
    bank_ref[3 * c:4 * c, :] = rb3.astype(cd)
    c3 = conv1x1(4, 2)                                            # cat3 = [rb1, x, rb2, rb3]

    o_ref[...] = c3.astype(o_ref.dtype)


# --------------------------------------------------------------------------- #
# Wrapper
# --------------------------------------------------------------------------- #

def _build_masks(h, w, r_pad, dtype):
    """(8, r_pad) validity masks for the 8 non-center taps (tap-major order).

    Sublane dim is exactly 8 (no padding waste); padded lanes are zero.
    Built on host to avoid relying on in-kernel vector integer div/mod."""
    hh = np.arange(h)[:, None]
    ww = np.arange(w)[None, :]
    rows = []
    for dh in (-1, 0, 1):
        for dw in (-1, 0, 1):
            if dh == 0 and dw == 0:
                continue
            valid = ((hh + dh >= 0) & (hh + dh < h) &
                     (ww + dw >= 0) & (ww + dw < w))
            flat = np.zeros((r_pad,), np.float32)
            flat[:h * w] = valid.astype(np.float32).reshape(-1)
            rows.append(flat)
    return jnp.asarray(np.stack(rows)).astype(dtype)


def _pack_params(p, c, compute_dtype):
    def pack3(w):  # OIHW (C, C, 3, 3) -> (C, 9C), K ordered (kh*3+kw)*C + cin
        return jnp.transpose(w, (0, 2, 3, 1)).reshape(c, 9 * c)

    w3 = jnp.stack([pack3(p["rb1"]["w1"]), pack3(p["rb1"]["w2"]),
                    pack3(p["rb2"]["w1"]), pack3(p["rb2"]["w2"]),
                    pack3(p["rb3"]["w1"]), pack3(p["rb3"]["w2"])]
                   ).astype(compute_dtype)                       # (6, C, 9C)
    b3 = jnp.stack([p["rb1"]["b1"], p["rb1"]["b2"],
                    p["rb2"]["b1"], p["rb2"]["b2"],
                    p["rb3"]["b1"], p["rb3"]["b2"]]
                   )[:, :, None].astype(jnp.float32)             # (6, C, 1)

    # 1x1 weights zero-padded along K to 4C; the kernel only dots the valid
    # K-prefix against the feature bank, so the padding never contributes.
    def pad1(w):
        return jnp.pad(w, ((0, 0), (0, 4 * c - w.shape[1])))
    w1 = jnp.stack([pad1(p["conv1_w"]), pad1(p["conv2_w"]),
                    pad1(p["conv3_w"])]).astype(compute_dtype)   # (3, C, 4C)
    b1 = jnp.stack([p["conv1_b"], p["conv2_b"], p["conv3_b"]]
                   )[:, :, None].astype(jnp.float32)             # (3, C, 1)
    return w3, b3, w1, b1


def cascading_block(x_nchw, params, *, roll_matches_jnp=True,
                    compute_dtype=jnp.bfloat16):
    n, c, h, w = x_nchw.shape
    r = h * w
    r_pad = ((r + 127) // 128) * 128          # lane-dense: pad H*W to 128 mult
    # NCHW -> (N, C, H*W): channels on sublanes, spatial on lanes.
    xr = x_nchw.reshape(n, c, r)
    if r_pad != r:
        xr = jnp.pad(xr, ((0, 0), (0, 0), (0, r_pad - r)))
    masks = _build_masks(h, w, r_pad, compute_dtype)
    w3, b3, w1, b1 = _pack_params(params, c, compute_dtype)

    kernel = functools.partial(
        _cascading_kernel, c=c, r_pad=r_pad, width=w,
        roll_matches_jnp=roll_matches_jnp, compute_dtype=compute_dtype)

    # Explicit VMEM budget (clamped to the v7x 64 MiB physical ceiling).
    cd_b = jnp.dtype(compute_dtype).itemsize
    io_b = jnp.dtype(x_nchw.dtype).itemsize
    est = (4 * c * r_pad * io_b                       # x/out blocks (2 bufs each)
           + (9 + 4) * c * r_pad * cd_b               # tap-stack + feature bank
           + 6 * c * r_pad * 4                        # live f32 temps
           + 2 * (54 + 12) * c * c * cd_b             # packed weights (2 bufs)
           + 2 * 8 * r_pad * cd_b + 2 * 9 * c * 4)    # masks + biases
    vmem_limit = int(min(max(2 * est, 32 * 1024 * 1024), 64 * 1024 * 1024))

    const = lambda shape: pl.BlockSpec(shape, lambda i: (0,) * len(shape))

    out = pl.pallas_call(
        kernel,
        out_shape=jax.ShapeDtypeStruct((n, c, r_pad), x_nchw.dtype),
        grid=(n,),                                    # one program per image
        in_specs=[
            pl.BlockSpec((None, c, r_pad), lambda i: (i, 0, 0)),  # activation
            const((8, r_pad)),                                    # tap masks
            const((6, c, 9 * c)),                                 # 3x3 weights
            const((6, c, 1)),                                     # 3x3 biases
            const((3, c, 4 * c)),                                 # 1x1 weights
            const((3, c, 1)),                                     # 1x1 biases
        ],
        out_specs=pl.BlockSpec((None, c, r_pad), lambda i: (i, 0, 0)),
        scratch_shapes=[
            pltpu.VMEM((9 * c, r_pad), compute_dtype),   # stacked tap operand
            pltpu.VMEM((4 * c, r_pad), compute_dtype),   # feature bank
        ],
        compiler_params=pltpu.CompilerParams(
            dimension_semantics=("parallel",),
            vmem_limit_bytes=vmem_limit),
    )(xr, masks, w3, b3, w1, b1)

    if r_pad != r:
        out = out[:, :, :r]
    return out.reshape(n, c, h, w)


def _roll_matches_jnp_convention():
    """One-time on-device calibration of pltpu.roll's rotation direction.

    The tap offsets depend on the shift sign convention; verify it once with a
    1-lane rotate and feed the result as a static flag (exact either way)."""
    def kern(x_ref, o_ref):
        o_ref[...] = pltpu.roll(x_ref[...], 1, 1)

    x = jax.lax.broadcasted_iota(jnp.float32, (8, 128), 1)
    y = pl.pallas_call(
        kern, out_shape=jax.ShapeDtypeStruct((8, 128), jnp.float32))(x)
    return bool(np.asarray(y)[0, 0] == 127.0)


# --------------------------------------------------------------------------- #
# Pure-JAX reference (NCHW, matches the PyTorch module)
# --------------------------------------------------------------------------- #

def reference_forward(x, p):
    prec = jax.lax.Precision.HIGHEST

    def conv3(v, w, b):
        out = jax.lax.conv_general_dilated(
            v, w, window_strides=(1, 1), padding="SAME",
            dimension_numbers=("NCHW", "OIHW", "NCHW"), precision=prec)
        return out + b.reshape(1, -1, 1, 1)

    def rb(v, q):
        mid = jax.nn.relu(conv3(v, q["w1"], q["b1"]))
        return jax.nn.relu(conv3(mid, q["w2"], q["b2"]) + v)

    def c1x1(v, w, b):
        return jax.nn.relu(jnp.einsum("nchw,oc->nohw", v, w, precision=prec) +
                           b.reshape(1, -1, 1, 1))

    rb1 = rb(x, p["rb1"]); cat1 = jnp.concatenate([rb1, x], 1)
    c1 = c1x1(cat1, p["conv1_w"], p["conv1_b"])
    rb2 = rb(c1, p["rb2"]); cat2 = jnp.concatenate([cat1, rb2], 1)
    c2 = c1x1(cat2, p["conv2_w"], p["conv2_b"])
    rb3 = rb(c2, p["rb3"]); cat3 = jnp.concatenate([cat2, rb3], 1)
    c3 = c1x1(cat3, p["conv3_w"], p["conv3_b"])
    return c3


# --------------------------------------------------------------------------- #
# Parameter init (PyTorch Conv2d-style layouts: OIHW / (Cout, Cin))
# --------------------------------------------------------------------------- #

def init_params(key, c):
    keys = iter(jax.random.split(key, 18))

    def u(shape, fan_in):
        bound = 1.0 / math.sqrt(fan_in)
        return jax.random.uniform(next(keys), shape, jnp.float32, -bound, bound)

    def rbp():
        return dict(w1=u((c, c, 3, 3), 9 * c), b1=u((c,), 9 * c),
                    w2=u((c, c, 3, 3), 9 * c), b2=u((c,), 9 * c))

    p = dict(rb1=rbp(), rb2=rbp(), rb3=rbp())
    for i, mult in enumerate((2, 3, 4), start=1):
        cin = mult * c
        p[f"conv{i}_w"] = u((c, cin), cin)
        p[f"conv{i}_b"] = u((c,), cin)
    return p


# --------------------------------------------------------------------------- #
# Main
# --------------------------------------------------------------------------- #

if __name__ == "__main__":
    # channels=16 keeps the test small while making every sublane slice
    # (tap stack / feature bank) tile-aligned even in bf16.
    channels = 16
    batch, height, width = 2, 16, 16

    key = jax.random.PRNGKey(0)
    pkey, xkey = jax.random.split(key)
    params = init_params(pkey, channels)
    x = jax.random.normal(xkey, (batch, channels, height, width), jnp.float32)

    roll_jnp = _roll_matches_jnp_convention()
    fwd = jax.jit(cascading_block,
                  static_argnames=("roll_matches_jnp", "compute_dtype"))
    out = jax.block_until_ready(fwd(x, params, roll_matches_jnp=roll_jnp))

    ref = reference_forward(x, params)
    assert out.shape == (batch, channels, height, width)

    out_np = np.asarray(out, dtype=np.float32)
    ref_np = np.asarray(ref, dtype=np.float32)
    # bf16 operands / f32 accumulation: aggregate error should be well below
    # 1e-2 relative; elementwise check catches gross tap/concat bugs.
    rel_l2 = np.linalg.norm(out_np - ref_np) / np.linalg.norm(ref_np)
    assert rel_l2 < 2e-2, f"relative L2 error too large: {rel_l2}"
    np.testing.assert_allclose(out_np, ref_np, rtol=1e-1, atol=1e-1)

    print("KERNEL_OK")
</pallas_src>

<mosaic_0001>
module attributes {stable_mosaic.version = 11 : i64} {
  func.func @kern(%arg0: memref<8x128xf32, #tpu.memory_space<vmem>>, %arg1: memref<8x128xf32, #tpu.memory_space<vmem>>) attributes {dimension_semantics = [], scalar_prefetch = 0 : i64, scratch_operands = 0 : i64, tpu.core_type = #tpu.core_type<tc>} {
    %c0 = arith.constant 0 : index
    %c0_0 = arith.constant 0 : index
    %0 = vector.load %arg0[%c0, %c0_0] : memref<8x128xf32, #tpu.memory_space<vmem>>, vector<8x128xf32>
    %c1_i32 = arith.constant 1 : i32
    %1 = tpu.dynamic_rotate %0 by %c1_i32 dim 1 : vector<8x128xf32>, i32 -> vector<8x128xf32>
    %c0_1 = arith.constant 0 : index
    %c0_2 = arith.constant 0 : index
    %2 = vector.load %arg1[%c0_1, %c0_2] : memref<8x128xf32, #tpu.memory_space<vmem>>, vector<8x128xf32>
    tpu.vector_store %arg1[%c0_1, %c0_2], %1 {strides = array<i32>} : memref<8x128xf32, #tpu.memory_space<vmem>>, vector<8x128xf32>,
    return
  }
}

</mosaic_0001>

<bundles_post_ra>
// kernel: tpu_custom_call.1
= control target key start
LH: loop header
LB: loop body
LE: loop exit
PB: predicated region body
PF: predicated region fallthrough
CT: control target
= control target key end

     0   :  { %6 = vsyncpa [#allocation3], 0  ;;  %s128_s0 = inlined_call_operand.hbm [shape: f32[8,128], index: 0, kind: input, shape index: {}]   ;;  %s129_s1 = inlined_call_operand.hbm [shape: f32[8,128], index: 1, kind: output, shape index: {}]  }
   0x1   :  { %7 = vsyncpa [#allocation4], 0  ;;  %s91_s6 = smov [#allocation2]   ;;  %s43_s10 = scalar_lea.hbm %s128_s0, 128 }
   0x2   :  { %s14_s7 = sshll.u32 %s91_s6, 4  ;;  %p44_p0 = scmp.ne.s32.totalorder %s128_s0, %s43_s10  ;;  %s15_s7 = int_to_ptr.vmem [resolvable:$true] %s14_s7 }
   0x3   :  { %p47_p1 = scmp.lt.u32.totalorder %s43_s10, %s128_s0 }
   0x5   :  { %p49_p2 = pnand %p47_p1, %p44_p0 }
   0x7   :  { %52 = shalt.err (!%p49_p2)
}
   0x8   :  { %s53_s15 = scalar_lea.vmem %s15_s7, 128  ;;  %p58_p4 = scmp.lt.s32.totalorder %s15_s7, %s15_s7 }
   0x9   :  { %p54_p3 = scmp.ne.s32.totalorder %s15_s7, %s53_s15  ;;  %p59_p5 = scmp.lt.s32.totalorder %s53_s15, %s53_s15 }
   0xb   :  { %p60_p6 = por %p59_p5, %p58_p4 }
   0xd   :  { %p61_p7 = pnand %p60_p6, %p54_p3 }
   0xf   :  { %64 = shalt.err (!%p61_p7)
}
  0x10   :  { %17 = dma.hbm_to_vmem [thread:$0]  %s128_s0, 128, %s15_s7, [#allocation3]  }
  0x11   :  { %87 = dma.done.wait [#allocation3], 128  }
  0x12   :  { %88 = vsyncadd [#allocation3], 4294967168  ;;  %v21_v0 = vld [vmem:[#allocation2] sm:$0xff]  ;;  %s92_s18 = smov 1   ;;  %s93_s19 = smov [#allocation5]  }
  0x13   :  { %22 = vrot.lane.b32.xlu0 %v21_v0, %s92_s18  ;;  %s31_s20 = sshll.u32 %s93_s19, 4  ;;  %s32_s20 = int_to_ptr.vmem [resolvable:$true] %s31_s20 }
  0x14   :  { %s65_s21 = scalar_lea.vmem %s32_s20, 128  ;;  %p70_p9 = scmp.lt.s32.totalorder %s32_s20, %s32_s20 }
  0x15   :  { %p66_p8 = scmp.ne.s32.totalorder %s32_s20, %s65_s21  ;;  %p71_p10 = scmp.lt.s32.totalorder %s65_s21, %s65_s21 }
  0x17   :  { %p72_p11 = por %p71_p10, %p70_p9 }
  0x19   :  { %p73_p12 = pnand %p72_p11, %p66_p8 }
  0x85   :  { %v23_v1 = vpop.permute.xlu0 %22 }
  0x86   :  { %24 = vst [vmem:[#allocation5] sm:$0xff] %v23_v1 }
  0x87   :  { %76 = shalt.err (!%p73_p12)
}
  0x88   :  { %s77_s0 = scalar_lea.hbm %s129_s1, 128 }
  0x89   :  { %p78_p13 = scmp.ne.s32.totalorder %s129_s1, %s77_s0  ;;  %p81_p0 = scmp.lt.u32.totalorder %s77_s0, %s129_s1 }
  0x8b   :  { %p83_p1 = pnand %p81_p0, %p78_p13 }
  0x8d   :  { %86 = shalt.err (!%p83_p1)
}
  0x8e   :  { %34 = dma.vmem_to_hbm [thread:$0]  %s32_s20, 128, %s129_s1, [#allocation4]  }
  0x8f   :  { %89 = dma.done.wait [#allocation4], 128  }
  0x90   :  { %90 = vsyncadd [#allocation4], 4294967168 }
  0x91   :  { %38 = vsyncpa [#allocation3], 1 }
  0x92   :  { %39 = vsyncpa [#allocation4], 1 }

</bundles_post_ra>
